<compile_context>
chip_gen: v7x
topology: tpu7x:2x2x1
jax: 0.10.0
libtpu: 0.0.40
codegen_flags: <defaults>
</compile_context>

<pallas_src>
import jax
import jax.numpy as jnp
from jax import lax
from jax.experimental import pallas as pl
from jax.experimental.pallas import tpu as pltpu


def _round_up(x, m):
    return ((x + m - 1) // m) * m


def _fit_tile(dim, tile_max, granularity):
    """Tile <= tile_max (multiple of `granularity`) that evenly tiles `dim`
    with minimal extra padding.  Returns (tile, padded_dim)."""
    dim = _round_up(dim, granularity)
    chunks = max(1, -(-dim // tile_max))
    tile = _round_up(-(-dim // chunks), granularity)
    return tile, chunks * tile


def _linear_kernel(x_ref, w_ref, b_ref, o_ref):
    # x_ref: (tm, tk) compute dtype, w_ref: (tn, tk) (nn.Linear layout),
    # b_ref: (1, tn) f32, o_ref: (tm, tn) f32.  The output block's index map
    # ignores k, so it stays resident in VMEM across the K axis and we can
    # accumulate into it directly (no separate scratch).
    k = pl.program_id(2)

    @pl.when(k == 0)
    def _():
        o_ref[...] = jnp.zeros_like(o_ref)

    # y_tile += x_tile @ w_tile.T — contraction on dim 1 of both operands
    # (trans-B), handled natively by the MXU; no materialized transpose.
    o_ref[...] += lax.dot_general(
        x_ref[...], w_ref[...],
        dimension_numbers=(((1,), (1,)), ((), ())),
        preferred_element_type=jnp.float32,
    )

    @pl.when(k == pl.num_programs(2) - 1)
    def _():
        o_ref[...] += b_ref[...]          # bias added exactly once, in f32


def logistic_regression_forward(x, weight, bias, *,
                                compute_dtype=jnp.bfloat16,
                                tm_max=1024, tn_max=512, tk_max=1024):
    """x: (B, D_in), weight: (D_out, D_in), bias: (D_out,) -> (B, D_out)."""
    B, D_in = x.shape
    D_out, _ = weight.shape

    # --- tile / padding selection -------------------------------------------
    # Sublane granularity 16 on M (safe for bf16 (16,128) packing), lane
    # granularity 128 on K and N (lane-dense output => unmasked stores).
    tm, m_pad = _fit_tile(B, tm_max, 16)
    tn, n_pad = _fit_tile(D_out, tn_max, 128)
    tk, k_pad = _fit_tile(D_in, tk_max, 128)

    # v7x megacore: guarantee >= 2 blocks across the parallel (i, j) grid so
    # both TensorCores get work (harmless on single-TC v5e/v6e).
    if (m_pad // tm) * (n_pad // tn) == 1 and tm >= 32:
        tm = _round_up(tm // 2, 16)
        m_pad = 2 * tm

    grid = (m_pad // tm, n_pad // tn, k_pad // tk)

    # --- pad + cast once -----------------------------------------------------
    x_p = x if (m_pad, k_pad) == (B, D_in) else jnp.pad(
        x, ((0, m_pad - B), (0, k_pad - D_in)))
    w_p = weight if (n_pad, k_pad) == (D_out, D_in) else jnp.pad(
        weight, ((0, n_pad - D_out), (0, k_pad - D_in)))
    b_p = bias if n_pad == D_out else jnp.pad(bias, (0, n_pad - D_out))
    x_p = x_p.astype(compute_dtype)
    w_p = w_p.astype(compute_dtype)
    b_p = b_p.astype(jnp.float32).reshape(1, n_pad)

    itemsize = jnp.dtype(compute_dtype).itemsize
    cost = pl.CostEstimate(
        flops=2 * m_pad * n_pad * k_pad,
        transcendentals=0,
        bytes_accessed=((m_pad * k_pad + n_pad * k_pad) * itemsize
                        + m_pad * n_pad * 4 + n_pad * 4),
    )

    out = pl.pallas_call(
        _linear_kernel,
        out_shape=jax.ShapeDtypeStruct((m_pad, n_pad), jnp.float32),
        grid_spec=pltpu.PrefetchScalarGridSpec(
            num_scalar_prefetch=0,
            grid=grid,
            in_specs=[
                pl.BlockSpec((tm, tk), lambda i, j, k: (i, k)),   # x
                pl.BlockSpec((tn, tk), lambda i, j, k: (j, k)),   # W, as-is
                pl.BlockSpec((1, tn), lambda i, j, k: (0, j)),    # bias row
            ],
            out_specs=pl.BlockSpec((tm, tn), lambda i, j, k: (i, j)),
        ),
        compiler_params=pltpu.CompilerParams(
            dimension_semantics=("parallel", "parallel", "arbitrary"),
            vmem_limit_bytes=32 * 1024 * 1024,   # tiles use <=~16 MiB live
        ),
        cost_estimate=cost,
    )(x_p, w_p, b_p)

    return out[:B, :D_out].astype(x.dtype)


if __name__ == "__main__":
    # Small shapes consistent with the module: batch=8, input_dim=32, output_dim=16
    batch, input_dim, output_dim = 8, 32, 16

    key = jax.random.PRNGKey(0)
    kx, kw, kb = jax.random.split(key, 3)

    x = jax.random.normal(kx, (batch, input_dim), dtype=jnp.float32)
    # Deterministic parameter init (uniform like nn.Linear's default range).
    limit = 1.0 / (input_dim ** 0.5)
    weight = jax.random.uniform(kw, (output_dim, input_dim),
                                minval=-limit, maxval=limit, dtype=jnp.float32)
    bias = jax.random.uniform(kb, (output_dim,),
                              minval=-limit, maxval=limit, dtype=jnp.float32)

    y_ref = x @ weight.T + bias

    # f32 compute path: tight check of the kernel structure.
    y32 = logistic_regression_forward(x, weight, bias,
                                      compute_dtype=jnp.float32)
    jax.block_until_ready(y32)
    assert y32.shape == (batch, output_dim)
    assert jnp.allclose(y32, y_ref, atol=1e-5, rtol=1e-5)

    # Default bf16-stream path (perf config): looser tolerance, f32 accumulate.
    y16 = logistic_regression_forward(x, weight, bias)
    jax.block_until_ready(y16)
    assert y16.shape == (batch, output_dim)
    assert jnp.allclose(y16, y_ref, atol=2e-2, rtol=2e-2)

    print("KERNEL_OK")
</pallas_src>

<mosaic_0001>
module attributes {stable_mosaic.version = 11 : i64} {
  func.func @_linear_kernel(%arg0: i32, %arg1: i32, %arg2: i32, %arg3: memref<16x128xf32, #tpu.memory_space<vmem>>, %arg4: memref<128x128xf32, #tpu.memory_space<vmem>>, %arg5: memref<1x128xf32, #tpu.memory_space<vmem>>, %arg6: memref<16x128xf32, #tpu.memory_space<vmem>>) attributes {dimension_semantics = [#tpu.dimension_semantics<parallel>, #tpu.dimension_semantics<parallel>, #tpu.dimension_semantics<arbitrary>], iteration_bounds = array<i64: 1, 1, 1>, scalar_prefetch = 0 : i64, scratch_operands = 0 : i64, tpu.core_type = #tpu.core_type<tc>, window_params = [{transform_indices = @transform_0, window_bounds = array<i64: 16, 128>}, {transform_indices = @transform_1, window_bounds = array<i64: 128, 128>}, {transform_indices = @transform_2, window_bounds = array<i64: 1, 128>}, {transform_indices = @transform_3, window_bounds = array<i64: 16, 128>}]} {
    %c0_i32 = arith.constant 0 : i32
    %0 = arith.cmpi eq, %arg2, %c0_i32 : i32
    %1 = arith.extui %0 : i1 to i32
    %c0_i32_0 = arith.constant 0 : i32
    %2 = arith.cmpi ne, %1, %c0_i32_0 : i32
    scf.if %2 {
      %cst_10 = arith.constant 0.000000e+00 : f32
      %12 = vector.broadcast %cst_10 : f32 to vector<16x128xf32>
      %c0_11 = arith.constant 0 : index
      %c0_12 = arith.constant 0 : index
      %13 = vector.load %arg6[%c0_11, %c0_12] : memref<16x128xf32, #tpu.memory_space<vmem>>, vector<16x128xf32>
      tpu.vector_store %arg6[%c0_11, %c0_12], %12 {strides = array<i32>} : memref<16x128xf32, #tpu.memory_space<vmem>>, vector<16x128xf32>,
    } else {
    }
    %c0 = arith.constant 0 : index
    %c0_1 = arith.constant 0 : index
    %3 = vector.load %arg6[%c0, %c0_1] : memref<16x128xf32, #tpu.memory_space<vmem>>, vector<16x128xf32>
    %c0_2 = arith.constant 0 : index
    %c0_3 = arith.constant 0 : index
    %4 = vector.load %arg3[%c0_2, %c0_3] : memref<16x128xf32, #tpu.memory_space<vmem>>, vector<16x128xf32>
    %c0_4 = arith.constant 0 : index
    %c0_5 = arith.constant 0 : index
    %5 = vector.load %arg4[%c0_4, %c0_5] : memref<128x128xf32, #tpu.memory_space<vmem>>, vector<128x128xf32>
    %cst = arith.constant dense<0.000000e+00> : vector<16x128xf32>
    %6 = tpu.matmul %4, %5, %cst {dimension_numbers = #tpu.dot_dimension_numbers<[1], [1], [0], [0], [0, 0, 1, 0], [], []>} : vector<16x128xf32>, vector<128x128xf32>, vector<16x128xf32> -> vector<16x128xf32>
    %7 = arith.addf %3, %6 : vector<16x128xf32>
    %c0_6 = arith.constant 0 : index
    %c0_7 = arith.constant 0 : index
    %8 = vector.load %arg6[%c0_6, %c0_7] : memref<16x128xf32, #tpu.memory_space<vmem>>, vector<16x128xf32>
    tpu.vector_store %arg6[%c0_6, %c0_7], %7 {strides = array<i32>} : memref<16x128xf32, #tpu.memory_space<vmem>>, vector<16x128xf32>,
    %c0_i32_8 = arith.constant 0 : i32
    %9 = arith.cmpi eq, %arg2, %c0_i32_8 : i32
    %10 = arith.extui %9 : i1 to i32
    %c0_i32_9 = arith.constant 0 : i32
    %11 = arith.cmpi ne, %10, %c0_i32_9 : i32
    scf.if %11 {
      %c0_10 = arith.constant 0 : index
      %c0_11 = arith.constant 0 : index
      %12 = vector.load %arg6[%c0_10, %c0_11] : memref<16x128xf32, #tpu.memory_space<vmem>>, vector<16x128xf32>
      %c0_12 = arith.constant 0 : index
      %c0_13 = arith.constant 0 : index
      %13 = vector.load %arg5[%c0_12, %c0_13] : memref<1x128xf32, #tpu.memory_space<vmem>>, vector<1x128xf32>
      %14 = vector.broadcast %13 : vector<1x128xf32> to vector<16x128xf32>
      %15 = arith.addf %12, %14 : vector<16x128xf32>
      %c0_14 = arith.constant 0 : index
      %c0_15 = arith.constant 0 : index
      %16 = vector.load %arg6[%c0_14, %c0_15] : memref<16x128xf32, #tpu.memory_space<vmem>>, vector<16x128xf32>
      tpu.vector_store %arg6[%c0_14, %c0_15], %15 {strides = array<i32>} : memref<16x128xf32, #tpu.memory_space<vmem>>, vector<16x128xf32>,
    } else {
    }
    return
  }
  func.func @transform_0(%arg0: i32, %arg1: i32, %arg2: i32) -> (i32, i32) {
    %c0_i32 = arith.constant 0 : i32
    return %arg0, %arg2 : i32, i32
  }
  func.func @transform_1(%arg0: i32, %arg1: i32, %arg2: i32) -> (i32, i32) {
    %c0_i32 = arith.constant 0 : i32
    return %arg1, %arg2 : i32, i32
  }
  func.func @transform_2(%arg0: i32, %arg1: i32, %arg2: i32) -> (i32, i32) {
    %c0_i32 = arith.constant 0 : i32
    %c0_i32_0 = arith.constant 0 : i32
    return %c0_i32, %arg1 : i32, i32
  }
  func.func @transform_3(%arg0: i32, %arg1: i32, %arg2: i32) -> (i32, i32) {
    %c0_i32 = arith.constant 0 : i32
    return %arg0, %arg1 : i32, i32
  }
}

</mosaic_0001>

<bundles_post_ra>
// kernel: tpu_custom_call.1
= control target key start
LH: loop header
LB: loop body
LE: loop exit
PB: predicated region body
PF: predicated region fallthrough
CT: control target
= control target key end

     0   :  { %8 = vsyncpa [#allocation3], 0  ;;  %s419_s0 = inlined_call_operand.hbm [shape: f32[16,128], index: 0, kind: input, shape index: {}]   ;;  %s420_s1 = inlined_call_operand.hbm [shape: f32[128,128], index: 1, kind: input, shape index: {}]   ;;  %s421_s2 = inlined_call_operand.vmem [shape: f32[1,128], index: 2, kind: input, shape index: {}]   ;;  %s422_s3 = inlined_call_operand.hbm [shape: f32[16,128], index: 3, kind: output, shape index: {}]  }
   0x1   :  { %9 = vsyncpa [#allocation6], 0 }
   0x2   :  { %10 = vsyncpa [#allocation4], 0  ;;  %s346_s12 = smov [#allocation2]   ;;  %s274_s16 = scalar_lea.hbm %s419_s0, 256 }
   0x3   :  { %s16_s13 = sshll.u32 %s346_s12, 4  ;;  %p275_p0 = scmp.ne.s32.totalorder %s419_s0, %s274_s16  ;;  %s17_s13 = int_to_ptr.vmem [resolvable:$true] %s16_s13 }
   0x4   :  { %p278_p1 = scmp.lt.u32.totalorder %s274_s16, %s419_s0 }
   0x6   :  { %p280_p2 = pnand %p278_p1, %p275_p0 }
   0x8   :  { %283 = shalt.err (!%p280_p2)
}
   0x9   :  { %s284_s21 = scalar_lea.vmem %s17_s13, 256  ;;  %p289_p4 = scmp.lt.s32.totalorder %s17_s13, %s17_s13 }
   0xa   :  { %p285_p3 = scmp.ne.s32.totalorder %s17_s13, %s284_s21  ;;  %p290_p5 = scmp.lt.s32.totalorder %s284_s21, %s284_s21 }
   0xc   :  { %p291_p6 = por %p290_p5, %p289_p4 }
   0xe   :  { %p292_p7 = pnand %p291_p6, %p285_p3 }
  0x10   :  { %295 = shalt.err (!%p292_p7)
}
  0x11   :  { %s347_s22 = smov 128   ;;  %s348_s23 = smov 8  }
  0x12   :  { %22 = dma.hbm_to_vmem [thread:$0]  %s419_s0, 256, %s17_s13, [#allocation3], %s347_s22, %s347_s22, %s348_s23  }
  0x13   :  { %s349_s26 = smov [#allocation5]   ;;  %s296_s30 = scalar_lea.hbm %s420_s1, 2048 }
  0x14   :  { %s28_s27 = sshll.u32 %s349_s26, 4  ;;  %p297_p8 = scmp.ne.s32.totalorder %s420_s1, %s296_s30  ;;  %s29_s27 = int_to_ptr.vmem [resolvable:$true] %s28_s27 }
  0x15   :  { %p300_p9 = scmp.lt.u32.totalorder %s296_s30, %s420_s1 }
  0x17   :  { %p302_p10 = pnand %p300_p9, %p297_p8 }
  0x19   :  { %305 = shalt.err (!%p302_p10)
}
  0x1a   :  { %s306_s8 = scalar_lea.vmem %s29_s27, 2048  ;;  %p311_p12 = scmp.lt.s32.totalorder %s29_s27, %s29_s27 }
  0x1b   :  { %p307_p11 = scmp.ne.s32.totalorder %s29_s27, %s306_s8  ;;  %p312_p13 = scmp.lt.s32.totalorder %s306_s8, %s306_s8 }
  0x1d   :  { %p313_p0 = por %p312_p13, %p311_p12 }
  0x1f   :  { %p314_p1 = pnand %p313_p0, %p307_p11 }
  0x21   :  { %317 = shalt.err (!%p314_p1)
}
  0x22   :  { %34 = dma.hbm_to_vmem [thread:$0]  %s420_s1, 2048, %s29_s27, [#allocation6], %s347_s22, %s347_s22, %s348_s23  }
  0x23   :  { %340 = dma.done.wait [#allocation3], 256  }
  0x24   :  { %341 = vsyncadd [#allocation3], 4294967040 }
  0x25   :  { %342 = dma.done.wait [#allocation6], 2048  }
  0x26   :  { %343 = vsyncadd [#allocation6], 4294965248  ;;  %v53_v0 = vld [vmem:[#allocation5] sm:$0xff]  ;;  %v54_v1 = vld [vmem:[#allocation5 + $0x8] sm:$0xff]  ;;  %s350_s11 = smov [#allocation7]  }
  0x27   :  { %v55_v2 = vld [vmem:[#allocation5 + $0x10] sm:$0xff]  ;;  %v236_v3 = vpack.c.bf16 %v54_v1, %v53_v0  ;;  %v56_v4 = vld [vmem:[#allocation5 + $0x18] sm:$0xff]  ;;  %v57_v7 = vld [vmem:[#allocation5 + $0x20] sm:$0xff]  ;;  %s169_s12 = sshll.u32 %s350_s11, 4  ;;  %s170_s12 = int_to_ptr.vmem [resolvable:$true] %s169_s12 }
  0x28   :  { %v240_v5 = vpack.c.bf16 %v56_v4, %v55_v2  ;;  %v51_v6 = vld [vmem:[#allocation2] sm:$0xff]  ;;  %v58_v8 = vld [vmem:[#allocation5 + $0x28] sm:$0xff]  ;;  %v60_v11 = vld [vmem:[#allocation5 + $0x38] sm:$0xff]  ;;  %s318_s13 = scalar_lea.vmem %s170_s12, 256  ;;  %p323_p3 = scmp.lt.s32.totalorder %s170_s12, %s170_s12 }
  0x29   :  { %237 = vmatprep.subr.bf16.mxu0 %v236_v3  ;;  %233 = vmatprep.mubr.f32.mxu0 %v51_v6  ;;  %v244_v9 = vpack.c.bf16 %v58_v8, %v57_v7  ;;  %v59_v10 = vld [vmem:[#allocation5 + $0x30] sm:$0xff]  ;;  %v61_v13 = vld [vmem:[#allocation5 + $0x40] sm:$0xff]  ;;  %v62_v14 = vld [vmem:[#allocation5 + $0x48] sm:$0xff]  ;;  %p319_p2 = scmp.ne.s32.totalorder %s170_s12, %s318_s13  ;;  %p324_p4 = scmp.lt.s32.totalorder %s318_s13, %s318_s13 }
  0x2a   :  { %239 = vmatpush3.bf16.xpose.msra.mxu0 %v236_v3  ;;  %v248_v12 = vpack.c.bf16 %v60_v11, %v59_v10  ;;  %v252_v15 = vpack.c.bf16 %v62_v14, %v61_v13  ;;  %v63_v16 = vld [vmem:[#allocation5 + $0x50] sm:$0xff]  ;;  %v64_v17 = vld [vmem:[#allocation5 + $0x58] sm:$0xff]  ;;  %v65_v19 = vld [vmem:[#allocation5 + $0x60] sm:$0xff] }
  0x2b   :  { %241 = vmatprep.subr.bf16.mxu0 %v240_v5  ;;  %v256_v18 = vpack.c.bf16 %v64_v17, %v63_v16  ;;  %v66_v20 = vld [vmem:[#allocation5 + $0x68] sm:$0xff]  ;;  %v67_v22 = vld [vmem:[#allocation5 + $0x70] sm:$0xff]  ;;  %v68_v23 = vld [vmem:[#allocation5 + $0x78] sm:$0xff]  ;;  %p325_p5 = por %p324_p4, %p323_p3 }
  0x2c   :  { %v260_v21 = vpack.c.bf16 %v66_v20, %v65_v19  ;;  %v264_v24 = vpack.c.bf16 %v68_v23, %v67_v22  ;;  %v52_v25 = vld [vmem:[#allocation2 + $0x8] sm:$0xff]  ;;  %v182_v27 = vld [vmem:[%s421_s2] ss:$0 sm:$0xff] }
  0x2d   :  { %p326_p6 = pnand %p325_p5, %p319_p2 }
  0x32   :  { %243 = vmatpush3.bf16.xpose.msra.mxu0 %v240_v5 }
  0x33   :  { %245 = vmatprep.subr.bf16.mxu0 %v244_v9 }
  0x3a   :  { %247 = vmatpush3.bf16.xpose.msra.mxu0 %v244_v9 }
  0x3b   :  { %249 = vmatprep.subr.bf16.mxu0 %v248_v12 }
  0x42   :  { %251 = vmatpush3.bf16.xpose.msra.mxu0 %v248_v12 }
  0x43   :  { %253 = vmatprep.subr.bf16.mxu0 %v252_v15 }
  0x4a   :  { %255 = vmatpush3.bf16.xpose.msra.mxu0 %v252_v15 }
  0x4b   :  { %257 = vmatprep.subr.bf16.mxu0 %v256_v18 }
  0x52   :  { %259 = vmatpush3.bf16.xpose.msra.mxu0 %v256_v18 }
  0x53   :  { %261 = vmatprep.subr.bf16.mxu0 %v260_v21 }
  0x5a   :  { %263 = vmatpush3.bf16.xpose.msra.mxu0 %v260_v21 }
  0x5b   :  { %265 = vmatprep.subr.bf16.mxu0 %v264_v24 }
  0x62   :  { %267 = vmatpush3.bf16.xpose.msra.mxu0 %v264_v24 }
  0x69   :  { %234 = vmatmul.mubr.f32.vlgmr.msra.gmra.mrb[0].mxu0 %v52_v25 }
 0x13c   :  { %v235_v26 = vpop.f32.mrb[0].mxu0 }
 0x13d   :  { %v135_v28 = vpop.f32.mrb[1].mxu0  ;;  %v161_v29 = vadd.f32 %v235_v26, %v182_v27 }
 0x13e   :  { %v160_v30 = vadd.f32 %v182_v27, %v135_v28 }
 0x13f   :  { %163 = vst [vmem:[#allocation7 + $0x8] sm:$0xff] %v161_v29 }
 0x140   :  { %162 = vst [vmem:[#allocation7] sm:$0xff] %v160_v30 }
 0x141   :  { %329 = shalt.err (!%p326_p6)
}
 0x142   :  { %s330_s16 = scalar_lea.hbm %s422_s3, 256 }
 0x143   :  { %p331_p7 = scmp.ne.s32.totalorder %s422_s3, %s330_s16  ;;  %p334_p8 = scmp.lt.u32.totalorder %s330_s16, %s422_s3 }
 0x145   :  { %p336_p9 = pnand %p334_p8, %p331_p7 }
 0x147   :  { %339 = shalt.err (!%p336_p9)
}
 0x148   :  { %175 = dma.vmem_to_hbm [thread:$0]  %s170_s12, 256, %s422_s3, [#allocation4], %s347_s22, %s347_s22, %s348_s23  }
 0x149   :  { %344 = dma.done.wait [#allocation4], 256  }
 0x14a   :  { %345 = vsyncadd [#allocation4], 4294967040 }
 0x14b   :  { %179 = vsyncpa [#allocation3], 1 }
 0x14c   :  { %180 = vsyncpa [#allocation6], 1 }
 0x14d   :  { %181 = vsyncpa [#allocation4], 1 }

</bundles_post_ra>
